<compile_context>
chip_gen: v5e
topology: v5e:2x2
jax: 0.10.0
libtpu: 0.0.40
codegen_flags: <defaults>
</compile_context>

<pallas_src>
import jax
import jax.numpy as jnp
from jax.experimental import pallas as pl
from jax.experimental.pallas import tpu as pltpu


def dec_kernel(x_ref, w1_ref, b1_ref, w2_ref, b2c_ref, out_ref):
    """One batch tile of the DEC forward (no global normalization).

    x:   (block_n, D_in)   batch tile (f32 or bf16)
    w1:  (D_in, H)   b1:  (1, H)
    w2:  (H, D_out)  b2c: (1, D_out)   (= b2 - encoder(ori_cluster_centers))
    out: (1, block_n)      un-normalized numerator, lane-dense.
    """
    # encoder: Linear -> ReLU -> Linear, f32 accumulation on the MXU.
    h = jnp.dot(x_ref[...], w1_ref[...], preferred_element_type=jnp.float32)
    h = jnp.maximum(h + b1_ref[...], 0.0).astype(w2_ref.dtype)
    # Second Linear with the center already folded into the bias:
    #   diff = (h @ w2 + b2) - c = h @ w2 + (b2 - c)
    diff = jnp.dot(h, w2_ref[...], preferred_element_type=jnp.float32) + b2c_ref[...]

    # Student-t numerator 1 / (1 + ||z - c||^2); epilogue kept in f32 (v5e VPU).
    # Transpose so the per-row reduction lands lane-dense for an unmasked store
    # (XLU transpose/reduce run off the VALU critical path).
    diff_t = jnp.transpose(diff)                                # (D_out, block_n)
    norm_sq = jnp.sum(diff_t * diff_t, axis=0, keepdims=True)   # (1, block_n)
    # Exact divide (pl.reciprocal(approx=True) would exceed the 1e-5 tolerance).
    out_ref[...] = 1.0 / (1.0 + norm_sq)


def dec_update(ori_cluster_centers, w1, b1, w2, b2):
    """encoder(ori_cluster_centers) == the PyTorch module's update().

    Batch-independent, so computed once in plain JAX (hoisted out of the
    per-forward kernel)."""
    h = jnp.maximum(ori_cluster_centers @ w1 + b1, 0.0)
    return h @ w2 + b2


def dec_forward(batch, cluster_centers, w1, b1, w2, b2,
                *, block_n=128, compute_dtype=jnp.float32):
    """clusterAssignment(encoder(batch)) with the embedded center pre-supplied.

    compute_dtype=jnp.bfloat16 casts x / w1 / w2 for the MXU (f32 accumulation,
    f32 epilogue) — preferred on v6e/v7x when the accuracy budget allows.
    """
    N, d_in = batch.shape
    hidden = w1.shape[1]
    d_out = w2.shape[1]
    assert block_n % 128 == 0, "block_n must be lane-dense (multiple of 128)"

    n_tiles = pl.cdiv(N, block_n)
    n_pad = n_tiles * block_n

    x = batch.astype(compute_dtype)
    if n_pad != N:
        x = jnp.pad(x, ((0, n_pad - N), (0, 0)))
    w1c = w1.astype(compute_dtype)
    w2c = w2.astype(compute_dtype)
    # Fold bias and embedded center: diff = h @ w2 + (b2 - c).  Tiny (1, d_out)
    # op, hoisted once per forward; stays f32.
    b2c = (b2 - cluster_centers).astype(jnp.float32)

    num = pl.pallas_call(
        dec_kernel,
        out_shape=jax.ShapeDtypeStruct((1, n_pad), jnp.float32),
        grid=(n_tiles,),
        in_specs=[
            pl.BlockSpec((block_n, d_in), lambda i: (i, 0)),   # batch tile (pipelined)
            pl.BlockSpec((d_in, hidden), lambda i: (0, 0)),    # w1 (VMEM-resident)
            pl.BlockSpec((1, hidden), lambda i: (0, 0)),       # b1 (resident)
            pl.BlockSpec((hidden, d_out), lambda i: (0, 0)),   # w2 (resident)
            pl.BlockSpec((1, d_out), lambda i: (0, 0)),        # b2 - center (resident)
        ],
        out_specs=pl.BlockSpec((1, block_n), lambda i: (0, i)),
        compiler_params=pltpu.CompilerParams(
            dimension_semantics=("parallel",),      # shard batch tiles across TCs (v7x)
            vmem_limit_bytes=32 * 1024 * 1024,      # explicit budget; fits v7x's 64 MiB
        ),
    )(x, w1c, b1, w2c, b2c)

    # Global normalization over the true batch (correct across tiles; cheap).
    num = num.reshape(n_pad)[:N]
    return num / jnp.sum(num)


def reference_forward(batch, c, w1, b1, w2, b2):
    def encode(v):
        return jnp.maximum(v @ w1 + b1, 0.0) @ w2 + b2
    z = encode(batch)
    zc = encode(c)
    ns = jnp.sum((z - zc) ** 2, axis=1)
    num = 1.0 / (1.0 + ns)
    return num / jnp.sum(num)


if __name__ == "__main__":
    input_dim, hidden_dim, output_dim = 256, 128, 64
    N = 8  # batch size

    key = jax.random.PRNGKey(0)
    k_x, k_c, k_w1, k_b1, k_w2, k_b2, k_x2 = jax.random.split(key, 7)

    batch = jax.random.normal(k_x, (N, input_dim), dtype=jnp.float32)
    ori_cluster_centers = jax.random.normal(k_c, (1, input_dim), dtype=jnp.float32)

    # Deterministic parameter init (synthetic; shapes match the nn.Linear layers,
    # stored as (in, out) = transpose of PyTorch's (out, in)).
    w1 = jax.random.normal(k_w1, (input_dim, hidden_dim), dtype=jnp.float32) * 0.05
    b1 = jax.random.normal(k_b1, (1, hidden_dim), dtype=jnp.float32) * 0.05
    w2 = jax.random.normal(k_w2, (hidden_dim, output_dim), dtype=jnp.float32) * 0.05
    b2 = jax.random.normal(k_b2, (1, output_dim), dtype=jnp.float32) * 0.05

    # update(): embed the cluster centers once (batch-independent, hoisted).
    cluster_centers = dec_update(ori_cluster_centers, w1, b1, w2, b2)

    # f32 path — matches the reference to tight tolerance.
    out = dec_forward(batch, cluster_centers, w1, b1, w2, b2)
    out = jax.block_until_ready(out)
    ref = reference_forward(batch, ori_cluster_centers, w1, b1, w2, b2)
    assert out.shape == (N,)
    assert jnp.allclose(out, ref, atol=1e-5, rtol=1e-5), (out, ref)

    # Multi-tile + padding path (N not a multiple of block_n).
    N2 = 300
    batch2 = jax.random.normal(k_x2, (N2, input_dim), dtype=jnp.float32)
    out2 = jax.block_until_ready(
        dec_forward(batch2, cluster_centers, w1, b1, w2, b2))
    ref2 = reference_forward(batch2, ori_cluster_centers, w1, b1, w2, b2)
    assert out2.shape == (N2,)
    assert jnp.allclose(out2, ref2, atol=1e-5, rtol=1e-5)

    # bf16-MXU path (v6e/v7x-friendly): f32 accumulate + f32 epilogue.
    out_bf16 = jax.block_until_ready(
        dec_forward(batch, cluster_centers, w1, b1, w2, b2,
                    compute_dtype=jnp.bfloat16))
    assert out_bf16.shape == (N,)
    assert bool(jnp.all(jnp.isfinite(out_bf16)))
    assert float(jnp.max(jnp.abs(out_bf16 - ref))) < 5e-2

    # TODO(synk): decoder / target_distribution are not exercised by forward()
    # and are intentionally not implemented as kernels.
    print("KERNEL_OK")
</pallas_src>

<mosaic_0001>
module attributes {stable_mosaic.version = 11 : i64} {
  func.func @dec_kernel(%arg0: i32, %arg1: memref<128x256xf32, #tpu.memory_space<vmem>>, %arg2: memref<256x128xf32, #tpu.memory_space<vmem>>, %arg3: memref<1x128xf32, #tpu.memory_space<vmem>>, %arg4: memref<128x64xf32, #tpu.memory_space<vmem>>, %arg5: memref<1x64xf32, #tpu.memory_space<vmem>>, %arg6: memref<1x128xf32, #tpu.memory_space<vmem>>) attributes {dimension_semantics = [#tpu.dimension_semantics<parallel>], iteration_bounds = array<i64: 1>, scalar_prefetch = 0 : i64, scratch_operands = 0 : i64, tpu.core_type = #tpu.core_type<tc>, window_params = [{transform_indices = @transform_0, window_bounds = array<i64: 128, 256>}, {pipeline_mode = #tpu.pipeline_mode<synchronous>, transform_indices = @transform_1, window_bounds = array<i64: 256, 128>}, {pipeline_mode = #tpu.pipeline_mode<synchronous>, transform_indices = @transform_2, window_bounds = array<i64: 1, 128>}, {pipeline_mode = #tpu.pipeline_mode<synchronous>, transform_indices = @transform_3, window_bounds = array<i64: 128, 64>}, {pipeline_mode = #tpu.pipeline_mode<synchronous>, transform_indices = @transform_4, window_bounds = array<i64: 1, 64>}, {transform_indices = @transform_5, window_bounds = array<i64: 1, 128>}]} {
    %c0 = arith.constant 0 : index
    %c0_0 = arith.constant 0 : index
    %0 = vector.load %arg1[%c0, %c0_0] : memref<128x256xf32, #tpu.memory_space<vmem>>, vector<128x256xf32>
    %c0_1 = arith.constant 0 : index
    %c0_2 = arith.constant 0 : index
    %1 = vector.load %arg2[%c0_1, %c0_2] : memref<256x128xf32, #tpu.memory_space<vmem>>, vector<256x128xf32>
    %cst = arith.constant dense<0.000000e+00> : vector<128x128xf32>
    %2 = tpu.matmul %0, %1, %cst {dimension_numbers = #tpu.dot_dimension_numbers<[1], [0], [0], [1], [0, 0, 1, 1], [], []>} : vector<128x256xf32>, vector<256x128xf32>, vector<128x128xf32> -> vector<128x128xf32>
    %c0_3 = arith.constant 0 : index
    %c0_4 = arith.constant 0 : index
    %3 = vector.load %arg3[%c0_3, %c0_4] : memref<1x128xf32, #tpu.memory_space<vmem>>, vector<1x128xf32>
    %4 = vector.broadcast %3 : vector<1x128xf32> to vector<128x128xf32>
    %5 = arith.addf %2, %4 : vector<128x128xf32>
    %cst_5 = arith.constant 0.000000e+00 : f32
    %6 = vector.broadcast %cst_5 : f32 to vector<128x128xf32>
    %7 = arith.maximumf %5, %6 : vector<128x128xf32>
    %c0_6 = arith.constant 0 : index
    %c0_7 = arith.constant 0 : index
    %8 = vector.load %arg4[%c0_6, %c0_7] : memref<128x64xf32, #tpu.memory_space<vmem>>, vector<128x64xf32>
    %cst_8 = arith.constant dense<0.000000e+00> : vector<128x64xf32>
    %9 = tpu.matmul %7, %8, %cst_8 {dimension_numbers = #tpu.dot_dimension_numbers<[1], [0], [0], [1], [0, 0, 1, 1], [], []>} : vector<128x128xf32>, vector<128x64xf32>, vector<128x64xf32> -> vector<128x64xf32>
    %c0_9 = arith.constant 0 : index
    %c0_10 = arith.constant 0 : index
    %10 = vector.load %arg5[%c0_9, %c0_10] : memref<1x64xf32, #tpu.memory_space<vmem>>, vector<1x64xf32>
    %11 = vector.broadcast %10 : vector<1x64xf32> to vector<128x64xf32>
    %12 = arith.addf %9, %11 : vector<128x64xf32>
    %13 = tpu.transpose %12, [1, 0] : vector<128x64xf32> -> vector<64x128xf32>
    %14 = arith.mulf %13, %13 : vector<64x128xf32>
    %cst_11 = arith.constant dense<0.000000e+00> : vector<128xf32>
    %15 = vector.multi_reduction <add>, %14, %cst_11 [0] : vector<64x128xf32> to vector<128xf32>
    %16 = vector.shape_cast %15 : vector<128xf32> to vector<1x128xf32>
    %cst_12 = arith.constant 1.000000e+00 : f32
    %17 = vector.broadcast %cst_12 : f32 to vector<1x128xf32>
    %18 = arith.addf %17, %16 : vector<1x128xf32>
    %cst_13 = arith.constant 1.000000e+00 : f32
    %19 = vector.broadcast %cst_13 : f32 to vector<1x128xf32>
    %20 = arith.divf %19, %18 : vector<1x128xf32>
    %c0_14 = arith.constant 0 : index
    %c0_15 = arith.constant 0 : index
    %21 = vector.load %arg6[%c0_14, %c0_15] : memref<1x128xf32, #tpu.memory_space<vmem>>, vector<1x128xf32>
    tpu.vector_store %arg6[%c0_14, %c0_15], %20 {strides = array<i32>} : memref<1x128xf32, #tpu.memory_space<vmem>>, vector<1x128xf32>,
    return
  }
  func.func @transform_0(%arg0: i32) -> (i32, i32) {
    %c0_i32 = arith.constant 0 : i32
    %c0_i32_0 = arith.constant 0 : i32
    return %arg0, %c0_i32 : i32, i32
  }
  func.func @transform_1(%arg0: i32) -> (i32, i32) {
    %c0_i32 = arith.constant 0 : i32
    %c0_i32_0 = arith.constant 0 : i32
    %c0_i32_1 = arith.constant 0 : i32
    return %c0_i32, %c0_i32_0 : i32, i32
  }
  func.func @transform_2(%arg0: i32) -> (i32, i32) {
    %c0_i32 = arith.constant 0 : i32
    %c0_i32_0 = arith.constant 0 : i32
    %c0_i32_1 = arith.constant 0 : i32
    return %c0_i32, %c0_i32_0 : i32, i32
  }
  func.func @transform_3(%arg0: i32) -> (i32, i32) {
    %c0_i32 = arith.constant 0 : i32
    %c0_i32_0 = arith.constant 0 : i32
    %c0_i32_1 = arith.constant 0 : i32
    return %c0_i32, %c0_i32_0 : i32, i32
  }
  func.func @transform_4(%arg0: i32) -> (i32, i32) {
    %c0_i32 = arith.constant 0 : i32
    %c0_i32_0 = arith.constant 0 : i32
    %c0_i32_1 = arith.constant 0 : i32
    return %c0_i32, %c0_i32_0 : i32, i32
  }
  func.func @transform_5(%arg0: i32) -> (i32, i32) {
    %c0_i32 = arith.constant 0 : i32
    %c0_i32_0 = arith.constant 0 : i32
    return %c0_i32, %arg0 : i32, i32
  }
}

</mosaic_0001>

<bundles_post_ra>
// kernel: tpu_custom_call.1
= control target key start
LH: loop header
LB: loop body
LE: loop exit
PB: predicated region body
PF: predicated region fallthrough
CT: control target
= control target key end

     0   :  { %10 = vsyncpa [#allocation3], 0  ;;  %s735_s0 = inlined_call_operand.hbm [shape: f32[128,256], index: 0, kind: input, shape index: {}]   ;;  %s736_s1 = inlined_call_operand.hbm [shape: f32[256,128], index: 1, kind: input, shape index: {}]   ;;  %s737_s2 = inlined_call_operand.vmem [shape: f32[1,128], index: 2, kind: input, shape index: {}]   ;;  %s738_s3 = inlined_call_operand.vmem [shape: f32[128,64], index: 3, kind: input, shape index: {}]   ;;  %s739_s4 = inlined_call_operand.vmem [shape: f32[1,64], index: 4, kind: input, shape index: {}]   ;;  %s740_s5 = inlined_call_operand.hbm [shape: f32[1,128], index: 5, kind: output, shape index: {}]  }
   0x1   :  { %11 = vsyncpa [#allocation6], 0 }
   0x2   :  { %12 = vsyncpa [#allocation4], 0  ;;  %s17_s20 = sshll.u32 %s735_s0, 4  ;;  %s577_s21 = smov [#allocation2]   ;;  %s18_s20 = int_to_ptr.hbm [resolvable:$true] %s17_s20 }
   0x3   :  { %s19_s22 = sshll.u32 %s577_s21, 4  ;;  %s30_s25 = sshll.u32 %s736_s1, 4  ;;  %s20_s22 = int_to_ptr.vmem [resolvable:$true] %s19_s22  ;;  %s31_s25 = int_to_ptr.hbm [resolvable:$true] %s30_s25 }
   0x4   :  { %s578_s26 = smov 256   ;;  %s579_s27 = smov 16  }
   0x5   :  { %25 = dma.hbm_to_vmem [thread:$0]  %s18_s20, 4096, %s20_s22, [#allocation3], %s578_s26, %s578_s26, %s579_s27  }
   0x6   :  { %s580_s28 = smov [#allocation5]   ;;  %s581_s30 = smov 128  }
   0x7   :  { %s32_s29 = sshll.u32 %s580_s28, 4  ;;  %s582_s6 = smov 8   ;;  %s33_s29 = int_to_ptr.vmem [resolvable:$true] %s32_s29 }
   0x8   :  { %38 = dma.hbm_to_vmem [thread:$0]  %s31_s25, 4096, %s33_s29, [#allocation6], %s581_s30, %s581_s30, %s582_s6  }
   0x9   :  { %571 = dma.done.wait [#allocation3], 4096  }
   0xa   :  { %572 = vsyncadd [#allocation3], 4294963200 }
   0xb   :  { %573 = dma.done.wait [#allocation6], 4096  }
   0xc   :  { %574 = vsyncadd [#allocation6], 4294963200  ;;  %v100_v0 = vld [vmem:[#allocation5 + $0x78] sm:$0xff]  ;;  %v99_v1 = vld [vmem:[#allocation5 + $0x70] sm:$0xff]  ;;  %s429_s15 = sshll.u32 %s740_s5, 4  ;;  %s430_s15 = int_to_ptr.hbm [resolvable:$true] %s429_s15 }
   0xd   :  { %v620_v2 = vld [vmem:[#allocation5 + $0xf8] sm:$0xff]  ;;  %121 = vmatpush.msra.mxu0 %v100_v0  ;;  %v623_v3 = vld [vmem:[#allocation5 + $0xf0] sm:$0xff]  ;;  %v98_v4 = vld [vmem:[#allocation5 + $0x68] sm:$0xff]  ;;  %440 = vmatpush.msra.mxu3 %v100_v0 }
   0xe   :  { %186 = vmatpush.msra.mxu1 %v620_v2  ;;  %v625_v5 = vld [vmem:[#allocation5 + $0xe8] sm:$0xff]  ;;  %v97_v6 = vld [vmem:[#allocation5 + $0x60] sm:$0xff]  ;;  %v96_v8 = vld [vmem:[#allocation5 + $0x58] sm:$0xff] }
   0xf   :  { %122 = vmatpush.msra.mxu0 %v99_v1  ;;  %v628_v7 = vld [vmem:[#allocation5 + $0xe0] sm:$0xff]  ;;  %441 = vmatpush.msra.mxu3 %v99_v1  ;;  %v631_v9 = vld [vmem:[#allocation5 + $0xd8] sm:$0xff]  ;;  %v95_v10 = vld [vmem:[#allocation5 + $0x50] sm:$0xff] }
  0x10   :  { %187 = vmatpush.msra.mxu1 %v623_v3  ;;  %v634_v11 = vld [vmem:[#allocation5 + $0xd0] sm:$0xff]  ;;  %v94_v12 = vld [vmem:[#allocation5 + $0x48] sm:$0xff]  ;;  %v93_v14 = vld [vmem:[#allocation5 + $0x40] sm:$0xff] }
  0x11   :  { %123 = vmatpush.msra.mxu0 %v98_v4  ;;  %442 = vmatpush.msra.mxu3 %v98_v4  ;;  %v637_v13 = vld [vmem:[#allocation5 + $0xc8] sm:$0xff]  ;;  %v640_v15 = vld [vmem:[#allocation5 + $0xc0] sm:$0xff]  ;;  %v92_v16 = vld [vmem:[#allocation5 + $0x38] sm:$0xff] }
  0x12   :  { %188 = vmatpush.msra.mxu1 %v625_v5  ;;  %v643_v17 = vld [vmem:[#allocation5 + $0xb8] sm:$0xff]  ;;  %v91_v18 = vld [vmem:[#allocation5 + $0x30] sm:$0xff]  ;;  %v90_v20 = vld [vmem:[#allocation5 + $0x28] sm:$0xff] }
  0x13   :  { %124 = vmatpush.msra.mxu0 %v97_v6  ;;  %443 = vmatpush.msra.mxu3 %v97_v6  ;;  %v646_v19 = vld [vmem:[#allocation5 + $0xb0] sm:$0xff]  ;;  %v106_v21 = vld [vmem:[#allocation5 + $0xa8] sm:$0xff]  ;;  %v89_v22 = vld [vmem:[#allocation5 + $0x20] sm:$0xff] }
  0x14   :  { %189 = vmatpush.msra.mxu1 %v628_v7  ;;  %v105_v23 = vld [vmem:[#allocation5 + $0xa0] sm:$0xff]  ;;  %v88_v24 = vld [vmem:[#allocation5 + $0x18] sm:$0xff]  ;;  %v87_v26 = vld [vmem:[#allocation5 + $0x10] sm:$0xff] }
  0x15   :  { %125 = vmatpush.msra.mxu0 %v96_v8  ;;  %444 = vmatpush.msra.mxu3 %v96_v8  ;;  %v104_v25 = vld [vmem:[#allocation5 + $0x98] sm:$0xff]  ;;  %v103_v27 = vld [vmem:[#allocation5 + $0x90] sm:$0xff]  ;;  %v86_v28 = vld [vmem:[#allocation5 + $0x8] sm:$0xff] }
  0x16   :  { %190 = vmatpush.msra.mxu1 %v631_v9  ;;  %v102_v29 = vld [vmem:[#allocation5 + $0x88] sm:$0xff]  ;;  %v85_v30 = vld [vmem:[#allocation5] sm:$0xff]  ;;  %v55_v35 = vld [vmem:[#allocation2 + $0x10] sm:$0xff] }
  0x17   :  { %126 = vmatpush.msra.mxu0 %v95_v10  ;;  %445 = vmatpush.msra.mxu3 %v95_v10  ;;  %v101_v31 = vld [vmem:[#allocation5 + $0x80] sm:$0xff]  ;;  %v54_v33 = vld [vmem:[#allocation2 + $0x8] sm:$0xff]  ;;  %v56_v36 = vld [vmem:[#allocation2 + $0x18] sm:$0xff] }
  0x18   :  { %191 = vmatpush.msra.mxu1 %v634_v11  ;;  %v53_v32 = vld [vmem:[#allocation2] sm:$0xff]  ;;  %v79_v37 = vld [vmem:[#allocation2 + $0xd0] sm:$0xff]  ;;  %v58_v39 = vld [vmem:[#allocation2 + $0x28] sm:$0xff] }
  0x19   :  { %127 = vmatpush.msra.mxu0 %v94_v12  ;;  %446 = vmatpush.msra.mxu3 %v94_v12  ;;  %v77_v34 = vld [vmem:[#allocation2 + $0xc0] sm:$0xff]  ;;  %v59_v41 = vld [vmem:[#allocation2 + $0x30] sm:$0xff]  ;;  %v60_v42 = vld [vmem:[#allocation2 + $0x38] sm:$0xff] }
  0x1a   :  { %192 = vmatpush.msra.mxu1 %v637_v13  ;;  %v57_v38 = vld [vmem:[#allocation2 + $0x20] sm:$0xff]  ;;  %v83_v43 = vld [vmem:[#allocation2 + $0xf0] sm:$0xff]  ;;  %v62_v45 = vld [vmem:[#allocation2 + $0x48] sm:$0xff] }
  0x1b   :  { %128 = vmatpush.msra.mxu0 %v93_v14  ;;  %447 = vmatpush.msra.mxu3 %v93_v14  ;;  %v81_v40 = vld [vmem:[#allocation2 + $0xe0] sm:$0xff]  ;;  %v78_v46 = vld [vmem:[#allocation2 + $0xc8] sm:$0xff]  ;;  %v63_v47 = vld [vmem:[#allocation2 + $0x50] sm:$0xff] }
  0x1c   :  { %193 = vmatpush.msra.mxu1 %v640_v15  ;;  %v61_v44 = vld [vmem:[#allocation2 + $0x40] sm:$0xff]  ;;  %v64_v48 = vld [vmem:[#allocation2 + $0x58] sm:$0xff]  ;;  %v66_v51 = vld [vmem:[#allocation2 + $0x68] sm:$0xff] }
  0x1d   :  { %129 = vmatpush.msra.mxu0 %v92_v16  ;;  %448 = vmatpush.msra.mxu3 %v92_v16  ;;  %v80_v49 = vld [vmem:[#allocation2 + $0xd8] sm:$0xff]  ;;  %v65_v50 = vld [vmem:[#allocation2 + $0x60] sm:$0xff]  ;;  %v82_v52 = vld [vmem:[#allocation2 + $0xe8] sm:$0xff] }
  0x1e   :  { %194 = vmatpush.msra.mxu1 %v643_v17  ;;  %v67_v53 = vld [vmem:[#allocation2 + $0x70] sm:$0xff]  ;;  %v68_v54 = vld [vmem:[#allocation2 + $0x78] sm:$0xff]  ;;  %v280_v58 = vld [vmem:[%s738_s3 + $0x68] sm:$0xff] }
  0x1f   :  { %130 = vmatpush.msra.mxu0 %v91_v18  ;;  %449 = vmatpush.msra.mxu3 %v91_v18  ;;  %v84_v55 = vld [vmem:[#allocation2 + $0xf8] sm:$0xff]  ;;  %v281_v57 = vld [vmem:[%s738_s3 + $0x70] sm:$0xff]  ;;  %v279_v59 = vld [vmem:[%s738_s3 + $0x60] sm:$0xff] }
  0x20   :  { %195 = vmatpush.msra.mxu1 %v646_v19  ;;  %v282_v56 = vld [vmem:[%s738_s3 + $0x78] sm:$0xff]  ;;  %v69_v60 = vld [vmem:[#allocation2 + $0x80] sm:$0xff]  ;;  %v70_v61 = vld [vmem:[#allocation2 + $0x88] sm:$0xff] }
  0x21   :  { %131 = vmatpush.msra.mxu0 %v90_v20  ;;  %450 = vmatpush.msra.mxu3 %v90_v20  ;;  %v278_v62 = vld [vmem:[%s738_s3 + $0x58] sm:$0xff]  ;;  %v277_v63 = vld [vmem:[%s738_s3 + $0x50] sm:$0xff]  ;;  %v276_v0 = vld [vmem:[%s738_s3 + $0x48] sm:$0xff] }
  0x22   :  { %196 = vmatpush.msra.mxu1 %v106_v21  ;;  %287 = vmatpush.msra.mxu2 %v282_v56  ;;  %v275_v1 = vld [vmem:[%s738_s3 + $0x40] sm:$0xff]  ;;  %v274_v4 = vld [vmem:[%s738_s3 + $0x38] sm:$0xff]  ;;  %v272_v6 = vld [vmem:[%s738_s3 + $0x28] sm:$0xff] }
  0x23   :  { %132 = vmatpush.msra.mxu0 %v89_v22  ;;  %451 = vmatpush.msra.mxu3 %v89_v22  ;;  %v73_v8 = vld [vmem:[#allocation2 + $0xa0] sm:$0xff]  ;;  %v75_v10 = vld [vmem:[#allocation2 + $0xb0] sm:$0xff]  ;;  %v270_v12 = vld [vmem:[%s738_s3 + $0x18] sm:$0xff] }
  0x24   :  { %197 = vmatpush.msra.mxu1 %v105_v23  ;;  %288 = vmatpush.msra.mxu2 %v281_v57  ;;  %v268_v14 = vld [vmem:[%s738_s3 + $0x8] sm:$0xff]  ;;  %v711_v16 = vld [vmem:[%s737_s2] ss:$0 sm:$0xff] }
  0x25   :  { %133 = vmatpush.msra.mxu0 %v88_v24  ;;  %452 = vmatpush.msra.mxu3 %v88_v24 }
  0x26   :  { %198 = vmatpush.msra.mxu1 %v104_v25  ;;  %289 = vmatpush.msra.mxu2 %v280_v58 }
  0x27   :  { %134 = vmatpush.msra.mxu0 %v87_v26  ;;  %453 = vmatpush.msra.mxu3 %v87_v26 }
  0x28   :  { %199 = vmatpush.msra.mxu1 %v103_v27  ;;  %290 = vmatpush.msra.mxu2 %v279_v59 }
  0x29   :  { %135 = vmatpush.msra.mxu0 %v86_v28  ;;  %454 = vmatpush.msra.mxu3 %v86_v28 }
  0x2a   :  { %200 = vmatpush.msra.mxu1 %v102_v29  ;;  %291 = vmatpush.msra.mxu2 %v278_v62 }
  0x2b   :  { %136 = vmatpush.msra.mxu0 %v85_v30  ;;  %455 = vmatpush.msra.mxu3 %v85_v30 }
  0x2c   :  { %201 = vmatpush.msra.mxu1 %v101_v31  ;;  %137 = vmatmul.f32.vlgmr.msra.gmra.mxu0 %v53_v32 }
  0x2d   :  { %202 = vmatmul.f32.vlgmr.msra.gmra.mxu1 %v54_v33  ;;  %173 = vmatmul.f32.vlgmr.msra.gmra.mxu3 %v77_v34 }
  0x2e   :  { %456 = vmatpush.msrb.mxu3 %v620_v2  ;;  %292 = vmatpush.msra.mxu2 %v277_v63  ;;  %v71_v2 = vld [vmem:[#allocation2 + $0x90] sm:$0xff] }
  0x30   :  { %457 = vmatpush.msrb.mxu3 %v623_v3  ;;  %v72_v3 = vld [vmem:[#allocation2 + $0x98] sm:$0xff]  ;;  %293 = vmatpush.msra.mxu2 %v276_v0 }
  0x32   :  { %458 = vmatpush.msrb.mxu3 %v625_v5  ;;  %294 = vmatpush.msra.mxu2 %v275_v1  ;;  %v273_v5 = vld [vmem:[%s738_s3 + $0x30] sm:$0xff] }
  0x34   :  { %140 = vmatmul.f32.gmra.mxu0 %v55_v35  ;;  %459 = vmatpush.msrb.mxu3 %v628_v7  ;;  %v271_v7 = vld [vmem:[%s738_s3 + $0x20] sm:$0xff] }
  0x35   :  { %205 = vmatmul.f32.gmra.mxu1 %v56_v36  ;;  %176 = vmatmul.f32.gmra.mxu3 %v79_v37 }
  0x36   :  { %460 = vmatpush.msrb.mxu3 %v631_v9  ;;  %295 = vmatpush.msra.mxu2 %v274_v4  ;;  %v74_v9 = vld [vmem:[#allocation2 + $0xa8] sm:$0xff] }
  0x38   :  { %461 = vmatpush.msrb.mxu3 %v634_v11  ;;  %296 = vmatpush.msra.mxu2 %v273_v5  ;;  %v76_v11 = vld [vmem:[#allocation2 + $0xb8] sm:$0xff] }
  0x3a   :  { %462 = vmatpush.msrb.mxu3 %v637_v13  ;;  %297 = vmatpush.msra.mxu2 %v272_v6  ;;  %v269_v13 = vld [vmem:[%s738_s3 + $0x10] sm:$0xff] }
  0x3c   :  { %143 = vmatmul.f32.gmra.mxu0 %v57_v38  ;;  %463 = vmatpush.msrb.mxu3 %v640_v15  ;;  %v267_v15 = vld [vmem:[%s738_s3] sm:$0xff] }
  0x3d   :  { %208 = vmatmul.f32.gmra.mxu1 %v58_v39  ;;  %179 = vmatmul.f32.gmra.mxu3 %v81_v40 }
  0x3e   :  { %464 = vmatpush.msrb.mxu3 %v643_v17  ;;  %298 = vmatpush.msra.mxu2 %v271_v7 }
  0x40   :  { %465 = vmatpush.msrb.mxu3 %v646_v19  ;;  %299 = vmatpush.msra.mxu2 %v270_v12 }
  0x42   :  { %466 = vmatpush.msrb.mxu3 %v106_v21  ;;  %300 = vmatpush.msra.mxu2 %v269_v13 }
  0x44   :  { %146 = vmatmul.f32.gmra.mxu0 %v59_v41  ;;  %467 = vmatpush.msrb.mxu3 %v105_v23 }
  0x45   :  { %211 = vmatmul.f32.gmra.mxu1 %v60_v42  ;;  %182 = vmatmul.f32.gmra.mxu3 %v83_v43 }
  0x46   :  { %468 = vmatpush.msrb.mxu3 %v104_v25  ;;  %301 = vmatpush.msra.mxu2 %v268_v14 }
  0x48   :  { %469 = vmatpush.msrb.mxu3 %v103_v27  ;;  %302 = vmatpush.msra.mxu2 %v267_v15 }
  0x4a   :  { %470 = vmatpush.msrb.mxu3 %v102_v29 }
  0x4c   :  { %149 = vmatmul.f32.gmra.mxu0 %v61_v44  ;;  %471 = vmatpush.msrb.mxu3 %v101_v31 }
  0x4d   :  { %214 = vmatmul.f32.gmra.mxu1 %v62_v45  ;;  %238 = vmatmul.f32.vlgmr.msrb.gmra.mxu3 %v78_v46 }
  0x4e   :  { %472 = vmatpush.msra.mxu3 %v282_v56 }
  0x50   :  { %473 = vmatpush.msra.mxu3 %v281_v57 }
  0x52   :  { %474 = vmatpush.msra.mxu3 %v280_v58 }
  0x54   :  { %152 = vmatmul.f32.gmra.mxu0 %v63_v47  ;;  %475 = vmatpush.msra.mxu3 %v279_v59 }
  0x55   :  { %217 = vmatmul.f32.gmra.mxu1 %v64_v48  ;;  %241 = vmatmul.f32.gmra.mxu3 %v80_v49 }
  0x56   :  { %476 = vmatpush.msra.mxu3 %v278_v62 }
  0x58   :  { %477 = vmatpush.msra.mxu3 %v277_v63 }
  0x5a   :  { %478 = vmatpush.msra.mxu3 %v276_v0 }
  0x5c   :  { %155 = vmatmul.f32.gmra.mxu0 %v65_v50  ;;  %479 = vmatpush.msra.mxu3 %v275_v1 }
  0x5d   :  { %220 = vmatmul.f32.gmra.mxu1 %v66_v51  ;;  %244 = vmatmul.f32.gmra.mxu3 %v82_v52 }
  0x5e   :  { %480 = vmatpush.msra.mxu3 %v274_v4 }
  0x60   :  { %481 = vmatpush.msra.mxu3 %v273_v5 }
  0x62   :  { %482 = vmatpush.msra.mxu3 %v272_v6 }
  0x64   :  { %158 = vmatmul.f32.gmra.mxu0 %v67_v53  ;;  %483 = vmatpush.msra.mxu3 %v271_v7 }
  0x65   :  { %223 = vmatmul.f32.gmra.mxu1 %v68_v54  ;;  %247 = vmatmul.f32.gmra.mxu3 %v84_v55 }
  0x66   :  { %484 = vmatpush.msra.mxu3 %v270_v12 }
  0x68   :  { %485 = vmatpush.msra.mxu3 %v269_v13 }
  0x6a   :  { %486 = vmatpush.msra.mxu3 %v268_v14 }
  0x6c   :  { %161 = vmatmul.f32.gmra.mxu0 %v69_v60  ;;  %487 = vmatpush.msra.mxu3 %v267_v15 }
  0x6d   :  { %226 = vmatmul.f32.gmra.mxu1 %v70_v61 }
  0x74   :  { %164 = vmatmul.f32.gmra.mxu0 %v71_v2 }
  0x75   :  { %229 = vmatmul.f32.gmra.mxu1 %v72_v3 }
  0x7c   :  { %167 = vmatmul.f32.gmra.mxu0 %v73_v8 }
  0x7d   :  { %232 = vmatmul.f32.gmra.mxu1 %v74_v9 }
  0x84   :  { %170 = vmatmul.f32.gmra.mxu0 %v75_v10 }
  0x85   :  { %235 = vmatmul.f32.gmra.mxu1 %v76_v11 }
  0xa9   :  { %v138_v17 = vpop.f32.mrf.mxu0 }
  0xaa   :  { %v203_v18 = vpop.f32.mrf.mxu1  ;;  %v139_v19 = vadd.f32 %v711_v16, %v138_v17 }
  0xac   :  { %v204_v20 = vadd.f32 %v203_v18, %v139_v19 }
  0xae   :  { %v251_v21 = vmax.f32 %v204_v20, 0.0 }
  0xb0   :  { %303 = vmatmul.f32.vlgmr.msra.gmra.mxu2 %v251_v21  ;;  %v174_v25 = vpop.f32.mrf.mxu3 }
  0xb1   :  { %v141_v22 = vpop.f32.mrf.mxu0  ;;  %v175_v46 = vadd.f32 %v711_v16, %v174_v25 }
  0xb2   :  { %v206_v23 = vpop.f32.mrf.mxu1  ;;  %v142_v24 = vadd.f32 %v711_v16, %v141_v22 }
  0xb4   :  { %v207_v26 = vadd.f32 %v206_v23, %v142_v24 }
  0xb6   :  { %v252_v27 = vmax.f32 %v207_v26, 0.0 }
  0xb8   :  { %306 = vmatmul.f32.gmra.mxu2 %v252_v27  ;;  %v177_v31 = vpop.f32.mrf.mxu3 }
  0xb9   :  { %v144_v28 = vpop.f32.mrf.mxu0  ;;  %v178_v55 = vadd.f32 %v711_v16, %v177_v31 }
  0xba   :  { %v209_v29 = vpop.f32.mrf.mxu1  ;;  %v145_v30 = vadd.f32 %v711_v16, %v144_v28 }
  0xbc   :  { %v210_v32 = vadd.f32 %v209_v29, %v145_v30 }
  0xbe   :  { %v253_v33 = vmax.f32 %v210_v32, 0.0 }
  0xc0   :  { %309 = vmatmul.f32.gmra.mxu2 %v253_v33  ;;  %v180_v37 = vpop.f32.mrf.mxu3 }
  0xc1   :  { %v147_v34 = vpop.f32.mrf.mxu0  ;;  %v181_v0 = vadd.f32 %v711_v16, %v180_v37 }
  0xc2   :  { %v212_v35 = vpop.f32.mrf.mxu1  ;;  %v148_v36 = vadd.f32 %v711_v16, %v147_v34  ;;  %v496_v34 = vld [vmem:[%s739_s4] ss:$0 sm:$0xff]  ;;  %s583_s4 = smov [#allocation7]  }
  0xc3   :  { %s427_s12 = sshll.u32 %s583_s4, 4  ;;  %s428_s12 = int_to_ptr.vmem [resolvable:$true] %s427_s12 }
  0xc4   :  { %v213_v38 = vadd.f32 %v212_v35, %v148_v36 }
  0xc6   :  { %v254_v39 = vmax.f32 %v213_v38, 0.0 }
  0xc8   :  { %312 = vmatmul.f32.gmra.mxu2 %v254_v39  ;;  %v183_v43 = vpop.f32.mrf.mxu3 }
  0xc9   :  { %v150_v40 = vpop.f32.mrf.mxu0  ;;  %v184_v9 = vadd.f32 %v711_v16, %v183_v43 }
  0xca   :  { %v215_v41 = vpop.f32.mrf.mxu1  ;;  %v151_v42 = vadd.f32 %v711_v16, %v150_v40 }
  0xcc   :  { %v216_v44 = vadd.f32 %v215_v41, %v151_v42 }
  0xce   :  { %v255_v45 = vmax.f32 %v216_v44, 0.0 }
  0xd0   :  { %315 = vmatmul.f32.gmra.mxu2 %v255_v45  ;;  %v239_v50 = vpop.f32.mrf.mxu3 }
  0xd1   :  { %v153_v47 = vpop.f32.mrf.mxu0  ;;  %v240_v51 = vadd.f32 %v239_v50, %v175_v46 }
  0xd2   :  { %v218_v48 = vpop.f32.mrf.mxu1  ;;  %v154_v49 = vadd.f32 %v711_v16, %v153_v47 }
  0xd3   :  { %v263_v53 = vmax.f32 %v240_v51, 0.0 }
  0xd4   :  { %v219_v52 = vadd.f32 %v218_v48, %v154_v49 }
  0xd5   :  { %339 = vmatmul.f32.vlgmr.msra.gmra.mxu3 %v263_v53 }
  0xd6   :  { %v256_v54 = vmax.f32 %v219_v52, 0.0 }
  0xd8   :  { %318 = vmatmul.f32.gmra.mxu2 %v256_v54  ;;  %v242_v59 = vpop.f32.mrf.mxu3 }
  0xd9   :  { %v156_v56 = vpop.f32.mrf.mxu0  ;;  %v243_v60 = vadd.f32 %v242_v59, %v178_v55 }
  0xda   :  { %v221_v57 = vpop.f32.mrf.mxu1  ;;  %v157_v58 = vadd.f32 %v711_v16, %v156_v56 }
  0xdb   :  { %v264_v62 = vmax.f32 %v243_v60, 0.0 }
  0xdc   :  { %v222_v61 = vadd.f32 %v221_v57, %v157_v58 }
  0xdd   :  { %342 = vmatmul.f32.gmra.mxu3 %v264_v62 }
  0xde   :  { %v257_v63 = vmax.f32 %v222_v61, 0.0 }
  0xe0   :  { %321 = vmatmul.f32.gmra.mxu2 %v257_v63  ;;  %v245_v4 = vpop.f32.mrf.mxu3 }
  0xe1   :  { %v159_v1 = vpop.f32.mrf.mxu0  ;;  %v246_v5 = vadd.f32 %v245_v4, %v181_v0 }
  0xe2   :  { %v224_v2 = vpop.f32.mrf.mxu1  ;;  %v160_v3 = vadd.f32 %v711_v16, %v159_v1 }
  0xe3   :  { %v265_v7 = vmax.f32 %v246_v5, 0.0 }
  0xe4   :  { %v225_v6 = vadd.f32 %v224_v2, %v160_v3 }
  0xe5   :  { %345 = vmatmul.f32.gmra.mxu3 %v265_v7 }
  0xe6   :  { %v258_v8 = vmax.f32 %v225_v6, 0.0 }
  0xe8   :  { %324 = vmatmul.f32.gmra.mxu2 %v258_v8  ;;  %v248_v13 = vpop.f32.mrf.mxu3 }
  0xe9   :  { %v162_v10 = vpop.f32.mrf.mxu0  ;;  %v249_v14 = vadd.f32 %v248_v13, %v184_v9 }
  0xea   :  { %v227_v11 = vpop.f32.mrf.mxu1  ;;  %v163_v12 = vadd.f32 %v711_v16, %v162_v10 }
  0xeb   :  { %v266_v17 = vmax.f32 %v249_v14, 0.0 }
  0xec   :  { %v228_v15 = vadd.f32 %v227_v11, %v163_v12 }
  0xed   :  { %348 = vmatmul.f32.gmra.mxu3 %v266_v17 }
  0xee   :  { %v259_v18 = vmax.f32 %v228_v15, 0.0 }
  0xf0   :  { %327 = vmatmul.f32.gmra.mxu2 %v259_v18 }
  0xf1   :  { %v165_v19 = vpop.f32.mrf.mxu0 }
  0xf2   :  { %v230_v20 = vpop.f32.mrf.mxu1  ;;  %v166_v21 = vadd.f32 %v711_v16, %v165_v19 }
  0xf4   :  { %v231_v22 = vadd.f32 %v230_v20, %v166_v21 }
  0xf6   :  { %v260_v23 = vmax.f32 %v231_v22, 0.0 }
  0xf8   :  { %330 = vmatmul.f32.gmra.mxu2 %v260_v23 }
  0xf9   :  { %v168_v24 = vpop.f32.mrf.mxu0 }
  0xfa   :  { %v233_v25 = vpop.f32.mrf.mxu1  ;;  %v169_v26 = vadd.f32 %v711_v16, %v168_v24 }
  0xfc   :  { %v234_v27 = vadd.f32 %v233_v25, %v169_v26 }
  0xfe   :  { %v261_v28 = vmax.f32 %v234_v27, 0.0 }
 0x100   :  { %333 = vmatmul.f32.gmra.mxu2 %v261_v28 }
 0x101   :  { %v171_v29 = vpop.f32.mrf.mxu0 }
 0x102   :  { %v236_v30 = vpop.f32.mrf.mxu1  ;;  %v172_v31 = vadd.f32 %v711_v16, %v171_v29 }
 0x104   :  { %v237_v32 = vadd.f32 %v236_v30, %v172_v31 }
 0x106   :  { %v262_v33 = vmax.f32 %v237_v32, 0.0 }
 0x108   :  { %336 = vmatmul.f32.gmra.mxu2 %v262_v33 }
 0x133   :  { %v304_v35 = vpop.f32.mrf.mxu2 }
 0x134   :  { %v305_v36 = vadd.f32 %v496_v34, %v304_v35 }
 0x136   :  { %352 = vxpose.xlu0.b32.start [1/16] (narrow) %v305_v36, 64 }
 0x13b   :  { %v307_v37 = vpop.f32.mrf.mxu2 }
 0x13c   :  { %v308_v38 = vadd.f32 %v496_v34, %v307_v37 }
 0x13e   :  { %353 = vxpose.xlu0.b32.cont [2/16] (narrow) %v308_v38, 64 }
 0x143   :  { %v310_v39 = vpop.f32.mrf.mxu2 }
 0x144   :  { %v311_v40 = vadd.f32 %v496_v34, %v310_v39 }
 0x146   :  { %354 = vxpose.xlu0.b32.cont [3/16] (narrow) %v311_v40, 64 }
 0x14b   :  { %v313_v41 = vpop.f32.mrf.mxu2 }
 0x14c   :  { %v314_v42 = vadd.f32 %v496_v34, %v313_v41 }
 0x14e   :  { %355 = vxpose.xlu0.b32.cont [4/16] (narrow) %v314_v42, 64 }
 0x153   :  { %v316_v16 = vpop.f32.mrf.mxu2 }
 0x154   :  { %v317_v43 = vadd.f32 %v496_v34, %v316_v16 }
 0x156   :  { %356 = vxpose.xlu0.b32.cont [5/16] (narrow) %v317_v43, 64 }
 0x158   :  { %v340_v56 = vpop.f32.mrf.mxu3 }
 0x159   :  { %v341_v59 = vadd.f32 %v496_v34, %v340_v56 }
 0x15b   :  { %v319_v44 = vpop.f32.mrf.mxu2 }
 0x15c   :  { %v320_v45 = vadd.f32 %v496_v34, %v319_v44 }
 0x15e   :  { %357 = vxpose.xlu0.b32.cont [6/16] (narrow) %v320_v45, 64 }
 0x160   :  { %v343_v60 = vpop.f32.mrf.mxu3 }
 0x161   :  { %v344_v61 = vadd.f32 %v496_v34, %v343_v60 }
 0x163   :  { %v322_v46 = vpop.f32.mrf.mxu2 }
 0x164   :  { %v323_v47 = vadd.f32 %v496_v34, %v322_v46 }
 0x166   :  { %358 = vxpose.xlu0.b32.cont [7/16] (narrow) %v323_v47, 64 }
 0x168   :  { %v346_v62 = vpop.f32.mrf.mxu3 }
 0x169   :  { %v347_v63 = vadd.f32 %v496_v34, %v346_v62 }
 0x16b   :  { %v325_v48 = vpop.f32.mrf.mxu2 }
 0x16c   :  { %v326_v49 = vadd.f32 %v496_v34, %v325_v48 }
 0x16e   :  { %359 = vxpose.xlu0.b32.cont [8/16] (narrow) %v326_v49, 64 }
 0x170   :  { %v349_v0 = vpop.f32.mrf.mxu3 }
 0x171   :  { %v350_v1 = vadd.f32 %v496_v34, %v349_v0 }
 0x173   :  { %v328_v50 = vpop.f32.mrf.mxu2 }
 0x174   :  { %v329_v51 = vadd.f32 %v496_v34, %v328_v50 }
 0x176   :  { %360 = vxpose.xlu0.b32.cont [9/16] (narrow) %v329_v51, 64 }
 0x17b   :  { %v331_v52 = vpop.f32.mrf.mxu2 }
 0x17c   :  { %v332_v53 = vadd.f32 %v496_v34, %v331_v52 }
 0x17e   :  { %361 = vxpose.xlu0.b32.cont [10/16] (narrow) %v332_v53, 64 }
 0x183   :  { %v334_v54 = vpop.f32.mrf.mxu2 }
 0x184   :  { %v335_v55 = vadd.f32 %v496_v34, %v334_v54 }
 0x186   :  { %362 = vxpose.xlu0.b32.cont [11/16] (narrow) %v335_v55, 64 }
 0x18b   :  { %v337_v57 = vpop.f32.mrf.mxu2 }
 0x18c   :  { %v338_v58 = vadd.f32 %v496_v34, %v337_v57 }
 0x18e   :  { %363 = vxpose.xlu0.b32.cont [12/16] (narrow) %v338_v58, 64 }
 0x196   :  { %364 = vxpose.xlu0.b32.cont [13/16] (narrow) %v341_v59, 64 }
 0x19e   :  { %365 = vxpose.xlu0.b32.cont [14/16] (narrow) %v344_v61, 64 }
 0x1a6   :  { %366 = vxpose.xlu0.b32.cont [15/16] (narrow) %v347_v63, 64 }
 0x1ae   :  { %367 = vxpose.xlu0.b32.end [16/16] (narrow) %v350_v1, 64 }
 0x1da   :  { %v368_v2 = vpop.trf.xlu0 }
 0x1db   :  { %v384_v9 = vmul.f32 %v368_v2, %v368_v2 }
 0x1e2   :  { %v369_v3 = vpop.trf.xlu0 }
 0x1e3   :  { %v385_v8 = vmul.f32 %v369_v3, %v369_v3 }
 0x1e5   :  { %v392_v11 = vadd.f32 %v385_v8, %v384_v9 }
 0x1ea   :  { %v370_v4 = vpop.trf.xlu0 }
 0x1eb   :  { %v386_v10 = vmul.f32 %v370_v4, %v370_v4 }
 0x1ed   :  { %v393_v14 = vadd.f32 %v392_v11, %v386_v10 }
 0x1f2   :  { %v371_v5 = vpop.trf.xlu0 }
 0x1f3   :  { %v387_v12 = vmul.f32 %v371_v5, %v371_v5 }
 0x1f5   :  { %v394_v17 = vadd.f32 %v393_v14, %v387_v12 }
 0x1fa   :  { %v372_v6 = vpop.trf.xlu0 }
 0x1fb   :  { %v388_v15 = vmul.f32 %v372_v6, %v372_v6 }
 0x1fd   :  { %v395_v19 = vadd.f32 %v394_v17, %v388_v15 }
 0x202   :  { %v373_v7 = vpop.trf.xlu0 }
 0x203   :  { %v389_v18 = vmul.f32 %v373_v7, %v373_v7 }
 0x205   :  { %v396_v21 = vadd.f32 %v395_v19, %v389_v18 }
 0x20a   :  { %v374_v13 = vpop.trf.xlu0 }
 0x20b   :  { %v390_v20 = vmul.f32 %v374_v13, %v374_v13 }
 0x20d   :  { %v397_v23 = vadd.f32 %v396_v21, %v390_v20 }
 0x212   :  { %v375_v22 = vpop.trf.xlu0 }
 0x213   :  { %v391_v24 = vmul.f32 %v375_v22, %v375_v22 }
 0x215   :  { %v398_v25 = vadd.f32 %v397_v23, %v391_v24 }
 0x217   :  { %v399_v26 = vrot.slane %v398_v25, 4 }
 0x219   :  { %v400_v27 = vadd.f32 %v399_v26, %v398_v25 }
 0x21b   :  { %v401_v28 = vrot.slane %v400_v27, 2 }
 0x21d   :  { %v402_v29 = vadd.f32 %v401_v28, %v400_v27 }
 0x21f   :  { %v403_v30 = vrot.slane %v402_v29, 1 }
 0x221   :  { %v404_v31 = vadd.f32 %v403_v30, %v402_v29 }
 0x223   :  { %v405_v32 = vadd.f32 1.0, %v404_v31 }
 0x225   :  { %497 = vrcp.f32 %v405_v32  ;;  %v417_v36 = vand.u32 2147483648, %v405_v32  ;;  %v415_v38 = vand.u32 2147483647, %v405_v32  ;;  %vm411_vm1 = vweird.f32 %v405_v32 }
 0x227   :  { %v418_v40 = vor.u32 1.1754944e-38, %v417_v36  ;;  %vm416_vm3 = vcmp.eq.f32.partialorder %v415_v38, 8.507059e+37 }
 0x22b   :  { %v498_v33 = vpop.eup %497 }
 0x22c   :  { %v407_v34 = vmul.f32 %v498_v33, %v405_v32  ;;  %vm412_vm0 = vweird.f32 %v498_v33 }
 0x22d   :  { %vm413_vm2 = vmor %vm411_vm1, %vm412_vm0 }
 0x22e   :  { %v408_v35 = vsub.f32 1.0, %v407_v34 }
 0x230   :  { %v409_v37 = vmul.f32 %v498_v33, %v408_v35 }
 0x232   :  { %v410_v39 = vadd.f32 %v498_v33, %v409_v37 }
 0x234   :  { %v414_v41 = vsel %vm413_vm2, %v498_v33, %v410_v39 }
 0x235   :  { %v419_v42 = vsel %vm416_vm3, %v418_v40, %v414_v41 }
 0x236   :  { %421 = vst [vmem:[#allocation7] sm:$0x1] %v419_v42 }
 0x237   :  { %432 = dma.vmem_to_hbm [thread:$0]  %s428_s12, 16, %s430_s15, [#allocation4]  }
 0x238   :  { %575 = dma.done.wait [#allocation4], 16  }
 0x239   :  { %576 = vsyncadd [#allocation4], 4294967280 }
 0x23a   :  { %437 = vsyncpa [#allocation3], 1 }
 0x23b   :  { %438 = vsyncpa [#allocation6], 1 }
 0x23c   :  { %439 = vsyncpa [#allocation4], 1 }

</bundles_post_ra>
